<compile_context>
chip_gen: v7x
topology: tpu7x:2x2x1
jax: 0.10.0
libtpu: 0.0.40
codegen_flags: <defaults>
</compile_context>

<pallas_src>
import functools

import numpy as np
import jax
import jax.numpy as jnp
from jax import lax
from jax.experimental import pallas as pl
from jax.experimental.pallas import tpu as pltpu


# ---------------------------------------------------------------------------
# Parameter setup (glue, plain numpy): exact port of the PyTorch __init__.
# ---------------------------------------------------------------------------
def make_cyclic_pattern(num_embeddings: int, embedding_dim: int, mean_pooling: bool = True):
    skip_base = np.power(num_embeddings, 1 / (embedding_dim // 2))
    skip_set = np.linspace(skip_base, num_embeddings, embedding_dim // 2, dtype='int')
    x = np.zeros((num_embeddings, embedding_dim))

    def basesin(x, omiga, fai=0):
        T = 2 * np.pi / omiga
        return np.sin(omiga * np.abs(np.mod(x, 2 * T) - T) + fai)

    def basecos(x, omiga, fai=0):
        T = 2 * np.pi / omiga
        return np.cos(omiga * np.abs(np.mod(x, 2 * T) - T) + fai)

    for i in range(embedding_dim):
        skip = skip_set[i // 3 * 3 + 1] if i // 3 * 3 + 1 < embedding_dim // 2 else skip_set[-1]
        if num_embeddings > skip:
            longer_pattern = np.arange(0, np.ceil(num_embeddings / skip) * skip + 0.01, 0.01)
        else:
            longer_pattern = np.arange(0, num_embeddings + 0.01, 0.01)
            skip = num_embeddings
        num = len(longer_pattern) - 1
        omiga = 2 * np.pi / skip
        fai = (0 if i <= embedding_dim // 2
               else 2 * np.pi * ((-i + embedding_dim // 2) / (embedding_dim // 2)))
        sel = np.linspace(0, num, num_embeddings + 1, dtype='int')
        if i % 2 == 1:
            x[:, i] = basecos(longer_pattern, omiga, fai)[sel][:num_embeddings]
        else:
            x[:, i] = basesin(longer_pattern, omiga, fai)[sel][:num_embeddings]

    pattern = x.astype(np.float32)
    pattern_sum = np.zeros_like(pattern)
    arange = np.arange(num_embeddings)
    pooling = [0] if not mean_pooling else [-2, -1, 0, 1, 2]
    time = 0
    for i in pooling:
        time += 1
        index = (arange + i + num_embeddings) % num_embeddings
        pattern_sum += pattern[index]
    pattern = 1.0 / time * pattern_sum - pattern.mean(0)
    return pattern.astype(np.float32)


# ---------------------------------------------------------------------------
# Pallas kernel: lane-dense gather via one-hot MXU matmuls.
#   idx_ref : (TR, G)            int32  -- G lookups per 128-lane output row
#   pat_ref : (G*N_pad, W)       f32    -- block-diagonal, lane-placed pattern
#   out_ref : (TR, W)            f32    -- W = G*D (128 in the packed case)
# ---------------------------------------------------------------------------
def _gather_kernel(idx_ref, pat_ref, out_ref, *, groups, n_pad, chunk_rows):
    tr, _ = out_ref.shape
    # Static sub-chunk loop keeps each (chunk, n_pad) one-hot ~16 vregs
    # (no VMEM spill); the store per chunk is a full-lane, unmasked vst.
    for s in range(0, tr, chunk_rows):
        ch = min(chunk_rows, tr - s)
        acc = None
        for g in range(groups):
            idx_col = idx_ref[s:s + ch, g:g + 1]                      # (ch, 1) int32
            onehot = (idx_col == lax.broadcasted_iota(jnp.int32, (ch, n_pad), 1)
                      ).astype(jnp.float32)                           # exact 0/1
            part = jnp.dot(onehot, pat_ref[g * n_pad:(g + 1) * n_pad, :],
                           preferred_element_type=jnp.float32)        # lane-placed
            acc = part if acc is None else acc + part
        out_ref[s:s + ch, :] = acc


def _round_up(x: int, mult: int) -> int:
    return ((x + mult - 1) // mult) * mult


def cyclic_positional_encoding_forward(indices, pattern, *, tile_m: int = 8192):
    """Equivalent of `pattern[indices]` for an integer index tensor `indices`."""
    orig_shape = indices.shape
    n, d = pattern.shape
    m = int(np.prod(orig_shape)) if orig_shape else 1

    # ---- layout parameters -------------------------------------------------
    n_pad = max(128, _round_up(n, 128))          # full-lane one-hot contraction
    if d < 128 and 128 % d == 0:
        groups = 128 // d                        # lookups packed per output row
    else:
        groups = 1
        # TODO(synk): when D neither divides nor is a multiple of 128 the
        # output stays lane-sparse (masked stores); no clean packing exists.
    w = groups * d                               # output lane width

    # ---- block-diagonal, lane-placed pattern table (VMEM-resident) ---------
    pat_block = jnp.zeros((groups * n_pad, w), dtype=jnp.float32)
    for g in range(groups):
        pat_block = pat_block.at[g * n_pad:g * n_pad + n,
                                 g * d:(g + 1) * d].set(pattern.astype(jnp.float32))

    # ---- tiling -------------------------------------------------------------
    rows = pl.cdiv(m, groups)                    # lane-dense output rows needed
    tr = max(8, _round_up(pl.cdiv(int(tile_m), groups), 8))
    if rows >= 1024:                             # keep >=2 grid steps -> both v7x TCs
        tr = min(tr, _round_up(pl.cdiv(rows, 2), 8))
    tr = max(8, min(tr, _round_up(rows, 8)))
    grid = pl.cdiv(rows, tr)
    rows_pad = grid * tr

    # one-hot sub-chunk: (chunk_rows, n_pad) f32 kept at ~16 vregs.
    chunk_rows = max(8, min(128, _round_up(max(1, 16384 // n_pad), 8)))
    chunk_rows = min(chunk_rows, tr)

    # ---- index stream: (rows_pad, groups) int32 (tiny, cheap to pad) -------
    idx_flat = jnp.reshape(indices, (-1,)).astype(jnp.int32)
    idx_flat = jnp.where(idx_flat < 0, idx_flat + n, idx_flat)   # torch-style negatives
    pad = rows_pad * groups - m
    if pad:
        idx_flat = jnp.pad(idx_flat, (0, pad))
    idx2d = idx_flat.reshape(rows_pad, groups)

    # ---- VMEM budget (lane-padded buffers, double-buffered) + cost hint ----
    idx_buf = _round_up(tr, 8) * 128 * 4
    out_buf = _round_up(tr, 8) * _round_up(w, 128) * 4
    pat_buf = groups * n_pad * _round_up(w, 128) * 4
    vmem_bytes = int(min(2 * (idx_buf + out_buf + pat_buf) + (8 << 20),
                         100 * 1024 * 1024))
    cost = pl.CostEstimate(flops=2 * rows_pad * groups * n_pad * w,
                           transcendentals=0,
                           bytes_accessed=m * 4 + groups * n_pad * w * 4 + rows * w * 4)

    kernel = functools.partial(_gather_kernel, groups=groups, n_pad=n_pad,
                               chunk_rows=chunk_rows)
    out = pl.pallas_call(
        kernel,
        out_shape=jax.ShapeDtypeStruct((rows, w), jnp.float32),
        grid_spec=pltpu.PrefetchScalarGridSpec(
            num_scalar_prefetch=0,
            grid=(grid,),
            in_specs=[
                pl.BlockSpec((tr, groups), lambda i: (i, 0)),          # index tile
                pl.BlockSpec((groups * n_pad, w), lambda i: (0, 0)),   # resident table
            ],
            out_specs=pl.BlockSpec((tr, w), lambda i: (i, 0)),         # lane-dense slab
        ),
        compiler_params=pltpu.CompilerParams(
            dimension_semantics=("parallel",),
            vmem_limit_bytes=vmem_bytes),
        cost_estimate=cost,
    )(idx2d, pat_block)

    # Pure layout plumbing back to (..., D).  The [:m] slice only triggers in
    # the rare m % groups != 0 ragged case (and for < groups extra rows).
    out = out.reshape(rows * groups, d)
    if rows * groups != m:
        out = out[:m]
    return out.reshape(orig_shape + (d,))


# ---------------------------------------------------------------------------
if __name__ == "__main__":
    num_embeddings = 16
    embedding_dim = 32

    pattern_np = make_cyclic_pattern(num_embeddings, embedding_dim, mean_pooling=True)
    pattern = jnp.asarray(pattern_np, dtype=jnp.float32)

    key = jax.random.PRNGKey(0)
    k1, k2, k3, k4 = jax.random.split(key, 4)

    # small case, single-tile packed case, ragged-tail case, multi-grid-step case.
    cases = [((2, 8), k1), ((2, 1024), k2), ((3, 5), k3), ((4, 4096), k4)]
    for shp, k in cases:
        indices = jax.random.randint(k, shp, 0, num_embeddings, dtype=jnp.int32)
        out = jax.block_until_ready(cyclic_positional_encoding_forward(indices, pattern))
        ref = pattern[indices]
        assert out.shape == shp + (embedding_dim,)
        assert out.dtype == jnp.float32
        np.testing.assert_allclose(np.asarray(out), np.asarray(ref), rtol=1e-6, atol=1e-6)

    print("KERNEL_OK")
</pallas_src>

<mosaic_0001>
module attributes {stable_mosaic.version = 11 : i64} {
  func.func @_gather_kernel(%arg0: i32, %arg1: memref<8x4xi32, #tpu.memory_space<vmem>>, %arg2: memref<512x128xf32, #tpu.memory_space<vmem>>, %arg3: memref<8x128xf32, #tpu.memory_space<vmem>>) attributes {dimension_semantics = [#tpu.dimension_semantics<parallel>], iteration_bounds = array<i64: 1>, scalar_prefetch = 0 : i64, scratch_operands = 0 : i64, tpu.core_type = #tpu.core_type<tc>, window_params = [{transform_indices = @transform_0, window_bounds = array<i64: 8, 4>}, {pipeline_mode = #tpu.pipeline_mode<synchronous>, transform_indices = @transform_1, window_bounds = array<i64: 512, 128>}, {transform_indices = @transform_2, window_bounds = array<i64: 8, 128>}]} {
    %c0 = arith.constant 0 : index
    %c0_0 = arith.constant 0 : index
    %0 = vector.load %arg1[%c0, %c0_0] : memref<8x4xi32, #tpu.memory_space<vmem>>, vector<8x1xi32>
    %1 = tpu.iota {dimensions = array<i32: 1>} : vector<8x128xi32>
    %2 = vector.broadcast %0 : vector<8x1xi32> to vector<8x128xi32>
    %3 = arith.cmpi eq, %2, %1 : vector<8x128xi32>
    %4 = arith.extui %3 : vector<8x128xi1> to vector<8x128xi32>
    %5 = arith.sitofp %4 : vector<8x128xi32> to vector<8x128xf32>
    %c0_1 = arith.constant 0 : index
    %c0_2 = arith.constant 0 : index
    %6 = vector.load %arg2[%c0_1, %c0_2] : memref<512x128xf32, #tpu.memory_space<vmem>>, vector<128x128xf32>
    %cst = arith.constant dense<0.000000e+00> : vector<8x128xf32>
    %7 = tpu.matmul %5, %6, %cst {dimension_numbers = #tpu.dot_dimension_numbers<[1], [0], [0], [1], [0, 0, 1, 1], [], []>} : vector<8x128xf32>, vector<128x128xf32>, vector<8x128xf32> -> vector<8x128xf32>
    %c0_3 = arith.constant 0 : index
    %c1 = arith.constant 1 : index
    %8 = vector.load %arg1[%c0_3, %c1] : memref<8x4xi32, #tpu.memory_space<vmem>>, vector<8x1xi32>
    %9 = tpu.iota {dimensions = array<i32: 1>} : vector<8x128xi32>
    %10 = vector.broadcast %8 : vector<8x1xi32> to vector<8x128xi32>
    %11 = arith.cmpi eq, %10, %9 : vector<8x128xi32>
    %12 = arith.extui %11 : vector<8x128xi1> to vector<8x128xi32>
    %13 = arith.sitofp %12 : vector<8x128xi32> to vector<8x128xf32>
    %c128 = arith.constant 128 : index
    %c0_4 = arith.constant 0 : index
    %14 = vector.load %arg2[%c128, %c0_4] : memref<512x128xf32, #tpu.memory_space<vmem>>, vector<128x128xf32>
    %cst_5 = arith.constant dense<0.000000e+00> : vector<8x128xf32>
    %15 = tpu.matmul %13, %14, %cst_5 {dimension_numbers = #tpu.dot_dimension_numbers<[1], [0], [0], [1], [0, 0, 1, 1], [], []>} : vector<8x128xf32>, vector<128x128xf32>, vector<8x128xf32> -> vector<8x128xf32>
    %16 = arith.addf %7, %15 : vector<8x128xf32>
    %c0_6 = arith.constant 0 : index
    %c2 = arith.constant 2 : index
    %17 = vector.load %arg1[%c0_6, %c2] : memref<8x4xi32, #tpu.memory_space<vmem>>, vector<8x1xi32>
    %18 = tpu.iota {dimensions = array<i32: 1>} : vector<8x128xi32>
    %19 = vector.broadcast %17 : vector<8x1xi32> to vector<8x128xi32>
    %20 = arith.cmpi eq, %19, %18 : vector<8x128xi32>
    %21 = arith.extui %20 : vector<8x128xi1> to vector<8x128xi32>
    %22 = arith.sitofp %21 : vector<8x128xi32> to vector<8x128xf32>
    %c256 = arith.constant 256 : index
    %c0_7 = arith.constant 0 : index
    %23 = vector.load %arg2[%c256, %c0_7] : memref<512x128xf32, #tpu.memory_space<vmem>>, vector<128x128xf32>
    %cst_8 = arith.constant dense<0.000000e+00> : vector<8x128xf32>
    %24 = tpu.matmul %22, %23, %cst_8 {dimension_numbers = #tpu.dot_dimension_numbers<[1], [0], [0], [1], [0, 0, 1, 1], [], []>} : vector<8x128xf32>, vector<128x128xf32>, vector<8x128xf32> -> vector<8x128xf32>
    %25 = arith.addf %16, %24 : vector<8x128xf32>
    %c0_9 = arith.constant 0 : index
    %c3 = arith.constant 3 : index
    %26 = vector.load %arg1[%c0_9, %c3] : memref<8x4xi32, #tpu.memory_space<vmem>>, vector<8x1xi32>
    %27 = tpu.iota {dimensions = array<i32: 1>} : vector<8x128xi32>
    %28 = vector.broadcast %26 : vector<8x1xi32> to vector<8x128xi32>
    %29 = arith.cmpi eq, %28, %27 : vector<8x128xi32>
    %30 = arith.extui %29 : vector<8x128xi1> to vector<8x128xi32>
    %31 = arith.sitofp %30 : vector<8x128xi32> to vector<8x128xf32>
    %c384 = arith.constant 384 : index
    %c0_10 = arith.constant 0 : index
    %32 = vector.load %arg2[%c384, %c0_10] : memref<512x128xf32, #tpu.memory_space<vmem>>, vector<128x128xf32>
    %cst_11 = arith.constant dense<0.000000e+00> : vector<8x128xf32>
    %33 = tpu.matmul %31, %32, %cst_11 {dimension_numbers = #tpu.dot_dimension_numbers<[1], [0], [0], [1], [0, 0, 1, 1], [], []>} : vector<8x128xf32>, vector<128x128xf32>, vector<8x128xf32> -> vector<8x128xf32>
    %34 = arith.addf %25, %33 : vector<8x128xf32>
    %c0_12 = arith.constant 0 : index
    %c0_13 = arith.constant 0 : index
    %35 = vector.load %arg3[%c0_12, %c0_13] : memref<8x128xf32, #tpu.memory_space<vmem>>, vector<8x128xf32>
    tpu.vector_store %arg3[%c0_12, %c0_13], %34 {strides = array<i32>} : memref<8x128xf32, #tpu.memory_space<vmem>>, vector<8x128xf32>,
    return
  }
  func.func @transform_0(%arg0: i32) -> (i32, i32) {
    %c0_i32 = arith.constant 0 : i32
    %c0_i32_0 = arith.constant 0 : i32
    return %arg0, %c0_i32 : i32, i32
  }
  func.func @transform_1(%arg0: i32) -> (i32, i32) {
    %c0_i32 = arith.constant 0 : i32
    %c0_i32_0 = arith.constant 0 : i32
    %c0_i32_1 = arith.constant 0 : i32
    return %c0_i32, %c0_i32_0 : i32, i32
  }
  func.func @transform_2(%arg0: i32) -> (i32, i32) {
    %c0_i32 = arith.constant 0 : i32
    %c0_i32_0 = arith.constant 0 : i32
    return %arg0, %c0_i32 : i32, i32
  }
}

</mosaic_0001>

<bundles_post_ra>
// kernel: tpu_custom_call.1
= control target key start
LH: loop header
LB: loop body
LE: loop exit
PB: predicated region body
PF: predicated region fallthrough
CT: control target
= control target key end

     0   :  { %7 = vsyncpa [#allocation3], 0  ;;  %s907_s0 = inlined_call_operand.vmem [shape: s32[8,4], index: 0, kind: input, shape index: {}]   ;;  %s908_s1 = inlined_call_operand.hbm [shape: f32[512,128], index: 1, kind: input, shape index: {}]   ;;  %s909_s2 = inlined_call_operand.hbm [shape: f32[4,128], index: 2, kind: output, shape index: {}]  }
   0x1   :  { %8 = vsyncpa [#allocation4], 0  ;;  %s801_s9 = smov [#allocation2]   ;;  %s753_s13 = scalar_lea.hbm %s908_s1, 8192 }
   0x2   :  { %s16_s10 = sshll.u32 %s801_s9, 4  ;;  %p754_p0 = scmp.ne.s32.totalorder %s908_s1, %s753_s13  ;;  %s17_s10 = int_to_ptr.vmem [resolvable:$true] %s16_s10 }
   0x3   :  { %p757_p1 = scmp.lt.u32.totalorder %s753_s13, %s908_s1 }
   0x5   :  { %p759_p2 = pnand %p757_p1, %p754_p0 }
   0x7   :  { %762 = shalt.err (!%p759_p2)
}
   0x8   :  { %s763_s18 = scalar_lea.vmem %s17_s10, 8192  ;;  %p768_p4 = scmp.lt.s32.totalorder %s17_s10, %s17_s10 }
   0x9   :  { %p764_p3 = scmp.ne.s32.totalorder %s17_s10, %s763_s18  ;;  %p769_p5 = scmp.lt.s32.totalorder %s763_s18, %s763_s18 }
   0xb   :  { %p770_p6 = por %p769_p5, %p768_p4 }
   0xd   :  { %p771_p7 = pnand %p770_p6, %p764_p3 }
   0xf   :  { %774 = shalt.err (!%p771_p7)
}
  0x10   :  { %s802_s19 = smov 128   ;;  %s803_s20 = smov 8  }
  0x11   :  { %22 = dma.hbm_to_vmem [thread:$0]  %s908_s1, 8192, %s17_s10, [#allocation3], %s802_s19, %s802_s19, %s803_s20  }
  0x12   :  { %797 = dma.done.wait [#allocation3], 8192  }
  0x13   :  { %798 = vsyncadd [#allocation3], 4294959104  ;;  %v804_v0 = vmov 1   ;;  %v805_v1 = vmov 0   ;;  %v806_v2 = vmov 0.0|0.0   ;;  %v26_v3 = vld [vmem:[%s907_s0] sm:$0xff]  ;;  %v27_v55 = vlaneseq }
  0x14   :  { %748 = vset.pattern.permute.xlu0 %v804_v0  ;;  %750 = vset.pattern.permute.xlu1 %v805_v1  ;;  %v57_v4 = vld [vmem:[#allocation2 + $0x80] sm:$0xff]  ;;  %v58_v5 = vld [vmem:[#allocation2 + $0x88] sm:$0xff]  ;;  %v59_v7 = vld [vmem:[#allocation2 + $0x90] sm:$0xff]  ;;  %vm807_vm0 = vmmov 0   ;;  %v808_v11 = vmov 0.0   ;;  %v809_v18 = vmov 2  }
  0x15   :  { %633 = vmatprep.subr.bf16.mxu1 %v806_v2  ;;  %681 = vmatprep.subr.bf16.mxu0 %v806_v2  ;;  %v634_v6 = vpack.c.bf16 %v58_v5, %v57_v4  ;;  %v60_v8 = vld [vmem:[#allocation2 + $0x98] sm:$0xff]  ;;  %v219_v9 = vld [vmem:[#allocation2 + $0x100] sm:$0xff]  ;;  %v220_v10 = vld [vmem:[#allocation2 + $0x108] sm:$0xff]  ;;  %v810_v19 = vmov 3   ;;  %v867_v58 = vand.u32 127, %v27_v55  ;;  %v811_v1 = vmov 1.0  }
  0x16   :  { %52 = vperm.xlu0 %748, %v26_v3   ;;  %30 = vperm.xlu1 %750, %v26_v3   ;;  %v637_v12 = vpack.c.bf16 %v60_v8, %v59_v7  ;;  %v682_v13 = vpack.c.bf16 %v220_v10, %v219_v9  ;;  %v61_v14 = vld [vmem:[#allocation2 + $0xa0] sm:$0xff]  ;;  %v62_v15 = vld [vmem:[#allocation2 + $0xa8] sm:$0xff]  ;;  %v221_v16 = vld [vmem:[#allocation2 + $0x110] sm:$0xff] }
  0x17   :  { %525 = vmatprep.mubr.msk.f32.mxu1 %vm807_vm0, %v808_v11  ;;  %595 = vmatprep.mubr.msk.f32.mxu0 %vm807_vm0, %v808_v11  ;;  %v222_v17 = vld [vmem:[#allocation2 + $0x118] sm:$0xff]  ;;  %v640_v20 = vpack.c.bf16 %v62_v15, %v61_v14  ;;  %v63_v22 = vld [vmem:[#allocation2 + $0xb0] sm:$0xff]  ;;  %v223_v24 = vld [vmem:[#allocation2 + $0x120] sm:$0xff] }
  0x18   :  { %635 = vmatpush3.bf16.msra.mxu1 %v634_v6  ;;  %683 = vmatpush3.bf16.msra.mxu0 %v682_v13  ;;  %v685_v21 = vpack.c.bf16 %v222_v17, %v221_v16  ;;  %v64_v23 = vld [vmem:[#allocation2 + $0xb8] sm:$0xff]  ;;  %v224_v25 = vld [vmem:[#allocation2 + $0x128] sm:$0xff]  ;;  %v65_v28 = vld [vmem:[#allocation2 + $0xc0] sm:$0xff] }
  0x19   :  { %636 = vmatprep.subr.bf16.mxu1 %v806_v2  ;;  %684 = vmatprep.subr.bf16.mxu0 %v806_v2  ;;  %v643_v26 = vpack.c.bf16 %v64_v23, %v63_v22  ;;  %v688_v27 = vpack.c.bf16 %v224_v25, %v223_v24  ;;  %v66_v29 = vld [vmem:[#allocation2 + $0xc8] sm:$0xff]  ;;  %v225_v30 = vld [vmem:[#allocation2 + $0x130] sm:$0xff]  ;;  %v226_v31 = vld [vmem:[#allocation2 + $0x138] sm:$0xff] }
  0x1a   :  { %749 = vset.pattern.permute.xlu0 %v809_v18  ;;  %751 = vset.pattern.permute.xlu1 %v810_v19  ;;  %v646_v32 = vpack.c.bf16 %v66_v29, %v65_v28  ;;  %v691_v33 = vpack.c.bf16 %v226_v31, %v225_v30  ;;  %v67_v34 = vld [vmem:[#allocation2 + $0xd0] sm:$0xff]  ;;  %v68_v35 = vld [vmem:[#allocation2 + $0xd8] sm:$0xff]  ;;  %v227_v36 = vld [vmem:[#allocation2 + $0x140] sm:$0xff] }
  0x1b   :  { %214 = vperm.xlu0 %749, %v26_v3   ;;  %307 = vperm.xlu1 %751, %v26_v3   ;;  %v228_v37 = vld [vmem:[#allocation2 + $0x148] sm:$0xff]  ;;  %v649_v38 = vpack.c.bf16 %v68_v35, %v67_v34  ;;  %v69_v40 = vld [vmem:[#allocation2 + $0xe0] sm:$0xff]  ;;  %v229_v42 = vld [vmem:[#allocation2 + $0x150] sm:$0xff] }
  0x1c   :  { %638 = vmatpush3.bf16.msra.mxu1 %v637_v12  ;;  %686 = vmatpush3.bf16.msra.mxu0 %v685_v21  ;;  %v694_v39 = vpack.c.bf16 %v228_v37, %v227_v36  ;;  %v70_v41 = vld [vmem:[#allocation2 + $0xe8] sm:$0xff]  ;;  %v230_v43 = vld [vmem:[#allocation2 + $0x158] sm:$0xff]  ;;  %v71_v46 = vld [vmem:[#allocation2 + $0xf0] sm:$0xff] }
  0x1d   :  { %639 = vmatprep.subr.bf16.mxu1 %v806_v2  ;;  %687 = vmatprep.subr.bf16.mxu0 %v806_v2  ;;  %v652_v44 = vpack.c.bf16 %v70_v41, %v69_v40  ;;  %v697_v45 = vpack.c.bf16 %v230_v43, %v229_v42  ;;  %v72_v47 = vld [vmem:[#allocation2 + $0xf8] sm:$0xff]  ;;  %v231_v48 = vld [vmem:[#allocation2 + $0x160] sm:$0xff]  ;;  %v232_v49 = vld [vmem:[#allocation2 + $0x168] sm:$0xff] }
  0x1e   :  { %v655_v50 = vpack.c.bf16 %v72_v47, %v71_v46  ;;  %v700_v51 = vpack.c.bf16 %v232_v49, %v231_v48  ;;  %v233_v52 = vld [vmem:[#allocation2 + $0x170] sm:$0xff]  ;;  %v234_v53 = vld [vmem:[#allocation2 + $0x178] sm:$0xff]  ;;  %v35_v56 = vld [vmem:[#allocation2] sm:$0xff] }
  0x1f   :  { %752 = vset.pattern.permute.xlu0 %v810_v19  ;;  %v703_v54 = vpack.c.bf16 %v234_v53, %v233_v52  ;;  %v36_v57 = vld [vmem:[#allocation2 + $0x8] sm:$0xff]  ;;  %v37_v61 = vld [vmem:[#allocation2 + $0x10] sm:$0xff]  ;;  %v38_v62 = vld [vmem:[#allocation2 + $0x18] sm:$0xff] }
  0x20   :  { %641 = vmatpush3.bf16.msra.mxu1 %v640_v20  ;;  %689 = vmatpush3.bf16.msra.mxu0 %v688_v27  ;;  %v658_v59 = vpack.c.bf16 %v36_v57, %v35_v56  ;;  %v312_v63 = vld [vmem:[#allocation2 + $0x180] sm:$0xff]  ;;  %v313_v0 = vld [vmem:[#allocation2 + $0x188] sm:$0xff]  ;;  %v661_v3 = vpack.c.bf16 %v38_v62, %v37_v61  ;;  %v314_v8 = vld [vmem:[#allocation2 + $0x190] sm:$0xff] }
  0x21   :  { %642 = vmatprep.subr.bf16.mxu1 %v806_v2  ;;  %690 = vmatprep.subr.bf16.mxu0 %v806_v2  ;;  %v706_v4 = vpack.c.bf16 %v313_v0, %v312_v63  ;;  %v39_v5 = vld [vmem:[#allocation2 + $0x20] sm:$0xff]  ;;  %v40_v6 = vld [vmem:[#allocation2 + $0x28] sm:$0xff]  ;;  %v315_v9 = vld [vmem:[#allocation2 + $0x198] sm:$0xff] }
  0x22   :  { %v664_v10 = vpack.c.bf16 %v40_v6, %v39_v5  ;;  %v709_v12 = vpack.c.bf16 %v315_v9, %v314_v8  ;;  %v41_v13 = vld [vmem:[#allocation2 + $0x30] sm:$0xff]  ;;  %v42_v14 = vld [vmem:[#allocation2 + $0x38] sm:$0xff]  ;;  %v316_v15 = vld [vmem:[#allocation2 + $0x1a0] sm:$0xff] }
  0x23   :  { %v317_v16 = vld [vmem:[#allocation2 + $0x1a8] sm:$0xff]  ;;  %v667_v17 = vpack.c.bf16 %v42_v14, %v41_v13  ;;  %v43_v19 = vld [vmem:[#allocation2 + $0x40] sm:$0xff]  ;;  %v318_v21 = vld [vmem:[#allocation2 + $0x1b0] sm:$0xff] }
  0x24   :  { %644 = vmatpush3.bf16.msra.mxu1 %v643_v26  ;;  %692 = vmatpush3.bf16.msra.mxu0 %v691_v33  ;;  %v712_v18 = vpack.c.bf16 %v317_v16, %v316_v15  ;;  %v44_v20 = vld [vmem:[#allocation2 + $0x48] sm:$0xff]  ;;  %v319_v22 = vld [vmem:[#allocation2 + $0x1b8] sm:$0xff]  ;;  %v45_v25 = vld [vmem:[#allocation2 + $0x50] sm:$0xff] }
  0x25   :  { %645 = vmatprep.subr.bf16.mxu1 %v806_v2  ;;  %693 = vmatprep.subr.bf16.mxu0 %v806_v2  ;;  %v670_v23 = vpack.c.bf16 %v44_v20, %v43_v19  ;;  %v715_v24 = vpack.c.bf16 %v319_v22, %v318_v21  ;;  %v320_v26 = vld [vmem:[#allocation2 + $0x1c0] sm:$0xff]  ;;  %v321_v27 = vld [vmem:[#allocation2 + $0x1c8] sm:$0xff]  ;;  %v323_v33 = vld [vmem:[#allocation2 + $0x1d8] sm:$0xff] }
  0x26   :  { %v718_v29 = vpack.c.bf16 %v321_v27, %v320_v26  ;;  %v47_v30 = vld [vmem:[#allocation2 + $0x60] sm:$0xff]  ;;  %v48_v31 = vld [vmem:[#allocation2 + $0x68] sm:$0xff]  ;;  %v49_v36 = vld [vmem:[#allocation2 + $0x70] sm:$0xff] }
  0x27   :  { %v676_v34 = vpack.c.bf16 %v48_v31, %v47_v30  ;;  %v50_v37 = vld [vmem:[#allocation2 + $0x78] sm:$0xff]  ;;  %v326_v43 = vld [vmem:[#allocation2 + $0x1f0] sm:$0xff] }
  0x28   :  { %647 = vmatpush3.bf16.msra.mxu1 %v646_v32  ;;  %695 = vmatpush3.bf16.msra.mxu0 %v694_v39  ;;  %v322_v32 = vld [vmem:[#allocation2 + $0x1d0] sm:$0xff]  ;;  %v325_v39 = vld [vmem:[#allocation2 + $0x1e8] sm:$0xff]  ;;  %v679_v40 = vpack.c.bf16 %v50_v37, %v49_v36 }
  0x29   :  { %648 = vmatprep.subr.bf16.mxu1 %v806_v2  ;;  %696 = vmatprep.subr.bf16.mxu0 %v806_v2  ;;  %v721_v35 = vpack.c.bf16 %v323_v33, %v322_v32 }
  0x2c   :  { %650 = vmatpush3.bf16.msra.mxu1 %v649_v38  ;;  %698 = vmatpush3.bf16.msra.mxu0 %v697_v45  ;;  %v324_v38 = vld [vmem:[#allocation2 + $0x1e0] sm:$0xff] }
  0x2d   :  { %651 = vmatprep.subr.bf16.mxu1 %v806_v2  ;;  %699 = vmatprep.subr.bf16.mxu0 %v806_v2  ;;  %v724_v42 = vpack.c.bf16 %v325_v39, %v324_v38 }
  0x30   :  { %653 = vmatpush3.bf16.msra.mxu1 %v652_v44  ;;  %701 = vmatpush3.bf16.msra.mxu0 %v700_v51  ;;  %v327_v44 = vld [vmem:[#allocation2 + $0x1f8] sm:$0xff] }
  0x31   :  { %654 = vmatprep.subr.bf16.mxu1 %v806_v2  ;;  %702 = vmatprep.subr.bf16.mxu0 %v806_v2  ;;  %v727_v45 = vpack.c.bf16 %v327_v44, %v326_v43 }
  0x34   :  { %656 = vmatpush3.bf16.msra.mxu1 %v655_v50  ;;  %704 = vmatpush3.bf16.msra.mxu0 %v703_v54 }
  0x35   :  { %657 = vmatprep.subr.bf16.mxu1 %v806_v2  ;;  %705 = vmatprep.subr.bf16.mxu0 %v806_v2 }
  0x95   :  { %v53_v60 = vpop.permute.xlu0 %52  ;;  %v31_v41 = vpop.permute.xlu1 %30 }
  0x96   :  { %vm54_vm1 = vcmp.eq.s32.totalorder %v53_v60, %v867_v58  ;;  %vm32_vm3 = vcmp.eq.s32.totalorder %v31_v41, %v867_v58 }
  0x97   :  { %526 = vmatmul.mubr.msk.f32.vlgmr.msra.gmra.mrb[0].mxu1 %vm54_vm1, %v811_v1 }
  0x98   :  { %659 = vmatpush3.bf16.msra.mxu1 %v658_v59  ;;  %560 = vmatprep.mubr.msk.f32.mxu1 %vm807_vm0, %v808_v11 }
  0x99   :  { %660 = vmatprep.subr.bf16.mxu1 %v806_v2 }
  0x9a   :  { %v215_v7 = vpop.permute.xlu0 %214  ;;  %v308_v46 = vpop.permute.xlu1 %307 }
  0x9b   :  { %vm216_vm2 = vcmp.eq.s32.totalorder %v215_v7, %v867_v58  ;;  %vm309_vm4 = vcmp.eq.s32.totalorder %v308_v46, %v867_v58 }
  0x9c   :  { %662 = vmatpush3.bf16.msra.mxu1 %v661_v3  ;;  %596 = vmatmul.mubr.msk.f32.vlgmr.msra.gmra.mrb[0].mxu0 %vm216_vm2, %v811_v1 }
  0x9d   :  { %707 = vmatpush3.bf16.msra.mxu0 %v706_v4  ;;  %663 = vmatprep.subr.bf16.mxu1 %v806_v2 }
  0x9e   :  { %708 = vmatprep.subr.bf16.mxu0 %v806_v2  ;;  %630 = vmatprep.mubr.msk.f32.mxu0 %vm807_vm0, %v808_v11  ;;  %v46_v11 = vld [vmem:[#allocation2 + $0x58] sm:$0xff] }
  0x9f   :  { %v673_v28 = vpack.c.bf16 %v46_v11, %v45_v25 }
  0xa0   :  { %665 = vmatpush3.bf16.msra.mxu1 %v664_v10 }
  0xa1   :  { %710 = vmatpush3.bf16.msra.mxu0 %v709_v12  ;;  %666 = vmatprep.subr.bf16.mxu1 %v806_v2 }
  0xa2   :  { %711 = vmatprep.subr.bf16.mxu0 %v806_v2 }
  0xa4   :  { %668 = vmatpush3.bf16.msra.mxu1 %v667_v17 }
  0xa5   :  { %713 = vmatpush3.bf16.msra.mxu0 %v712_v18  ;;  %669 = vmatprep.subr.bf16.mxu1 %v806_v2 }
  0xa6   :  { %714 = vmatprep.subr.bf16.mxu0 %v806_v2 }
  0xa8   :  { %671 = vmatpush3.bf16.msra.mxu1 %v670_v23 }
  0xa9   :  { %716 = vmatpush3.bf16.msra.mxu0 %v715_v24  ;;  %672 = vmatprep.subr.bf16.mxu1 %v806_v2 }
  0xaa   :  { %717 = vmatprep.subr.bf16.mxu0 %v806_v2 }
  0xac   :  { %674 = vmatpush3.bf16.msra.mxu1 %v673_v28 }
  0xad   :  { %719 = vmatpush3.bf16.msra.mxu0 %v718_v29  ;;  %675 = vmatprep.subr.bf16.mxu1 %v806_v2 }
  0xae   :  { %720 = vmatprep.subr.bf16.mxu0 %v806_v2 }
  0xb0   :  { %677 = vmatpush3.bf16.msra.mxu1 %v676_v34 }
  0xb1   :  { %722 = vmatpush3.bf16.msra.mxu0 %v721_v35  ;;  %678 = vmatprep.subr.bf16.mxu1 %v806_v2 }
  0xb2   :  { %723 = vmatprep.subr.bf16.mxu0 %v806_v2 }
  0xb4   :  { %680 = vmatpush3.bf16.msra.mxu1 %v679_v40 }
  0xb5   :  { %725 = vmatpush3.bf16.msra.mxu0 %v724_v42 }
  0xb6   :  { %726 = vmatprep.subr.bf16.mxu0 %v806_v2 }
  0xb7   :  { %561 = vmatmul.mubr.msk.f32.vlgmr.msra.gmra.mrb[0].mxu1 %vm32_vm3, %v811_v1 }
  0xb9   :  { %728 = vmatpush3.bf16.msra.mxu0 %v727_v45 }
  0xbc   :  { %631 = vmatmul.mubr.msk.f32.vlgmr.msra.gmra.mrb[0].mxu0 %vm309_vm4, %v811_v1 }
 0x18a   :  { %v209_v47 = vpop.f32.mrb[0].mxu1 }
 0x18b   :  { %v562_v48 = vpop.f32.mrb[1].mxu1 }
 0x18f   :  { %v394_v49 = vpop.f32.mrb[0].mxu0 }
 0x190   :  { %v729_v50 = vadd.f32 %v394_v49, %v209_v47  ;;  %v632_v51 = vpop.f32.mrb[1].mxu0 }
 0x192   :  { %399 = vst [vmem:[#allocation5] sm:$0xff] %v729_v50 }
 0x193   :  { %404 = vsyncadd [#allocation4], 64  ;;  %s812_s0 = smov [#allocation5]  }
 0x194   :  { %s405_s1 = sshll.u32 %s812_s0, 4  ;;  %s406_s1 = int_to_ptr.vmem [resolvable:$true] %s405_s1 }
 0x195   :  { %s775_s25 = scalar_lea.vmem %s406_s1, 64  ;;  %s779_s26 = scalar_lea.vmem %s406_s1, 128 }
 0x196   :  { %p776_p8 = scmp.ne.s32.totalorder %s406_s1, %s775_s25  ;;  %p780_p9 = scmp.lt.s32.totalorder %s406_s1, %s406_s1 }
 0x197   :  { %p781_p10 = scmp.lt.s32.totalorder %s779_s26, %s775_s25 }
 0x199   :  { %p782_p11 = por %p781_p10, %p780_p9 }
 0x19b   :  { %p783_p12 = pnand %p782_p11, %p776_p8 }
 0x19d   :  { %786 = shalt.err (!%p783_p12)
}
 0x19e   :  { %s787_s29 = scalar_lea.hbm %s909_s2, 64 }
 0x19f   :  { %p788_p13 = scmp.ne.s32.totalorder %s909_s2, %s787_s29  ;;  %p791_p0 = scmp.lt.u32.totalorder %s787_s29, %s909_s2 }
 0x1a1   :  { %p793_p1 = pnand %p791_p0, %p788_p13 }
 0x1a3   :  { %796 = shalt.err (!%p793_p1)
}
 0x1a4   :  { %s813_s6 = smov 64   ;;  %s814_s7 = smov 4  }
 0x1a5   :  { %411 = dma.vmem_to_hbm [thread:$0]  %s406_s1, 64, %s909_s2, [#allocation4], %s813_s6, %s813_s6, %s814_s7  }
 0x1a6   :  { %799 = dma.done.wait [#allocation4], 128  }
 0x1a7   :  { %800 = vsyncadd [#allocation4], 4294967168 }
 0x1a8   :  { %415 = vsyncpa [#allocation3], 1 }
 0x1a9   :  { %416 = vsyncpa [#allocation4], 1 }

</bundles_post_ra>
